<compile_context>
chip_gen: v7x
topology: tpu7x:2x2x1
jax: 0.10.0
libtpu: 0.0.40
codegen_flags: <defaults>
</compile_context>

<pallas_src>
import math
import functools

import jax
import jax.numpy as jnp
from jax import lax
from jax.experimental import pallas as pl
from jax.experimental.pallas import tpu as pltpu

LN_EPS = 1e-5                      # nn.LayerNorm default eps
_LANE = 128
_SUBLANE = 8
_INV_SQRT2 = 1.0 / math.sqrt(2.0)
_SQRT_2_OVER_PI = math.sqrt(2.0 / math.pi)
_TM_CANDIDATES = (1024, 512, 256, 128, 64, 32, 16, 8)
_FALLBACK_VMEM_CAP = 64 * 1024 * 1024   # conservative (v7x) if query fails


def _round_up(x, m):
    return (x + m - 1) // m * m


def _vmem_capacity_bytes():
    """Physical VMEM per core (128 MiB v5e/v6e, 64 MiB v7x); safe fallback."""
    try:
        info = pltpu.get_tpu_info()
        cap = getattr(info, "vmem_capacity_bytes", None)
        if cap:
            return int(cap)
    except Exception:
        pass
    return _FALLBACK_VMEM_CAP


def _choose_tm(m, tm_max):
    """Largest row tile with >=2 M-tiles (v7x 2-TC / megacore) and <=~12.5% pad waste."""
    m8 = _round_up(m, _SUBLANE)
    cands = [t for t in _TM_CANDIDATES if t <= tm_max] or [8]
    for t in cands:
        if 2 * t > m8:
            continue                      # would leave one TensorCore idle
        if (_round_up(m, t) - m) * 8 <= m:  # waste <= 12.5%
            return t
    for t in cands:                       # fall back: just require >=2 tiles
        if 2 * t <= m8:
            return t
    return m8                             # tiny input: single full-row tile


def _gelu(y, approximate):
    if approximate:
        # tanh-approx GELU: transcendental goes to the EUP (own bundle slot),
        # freeing VALU cycles. Numerics differ slightly from exact erf GELU.
        return 0.5 * y * (1.0 + jnp.tanh(_SQRT_2_OVER_PI * (y + 0.044715 * y * y * y)))
    # exact (erf) GELU — matches ACT2FN['gelu'] / torch.nn.functional.gelu
    return 0.5 * y * (1.0 + lax.erf(y * _INV_SQRT2))


def _layernorm(y, g, beta, d_out_real, d_out_pad):
    # y: (tm, d_out_pad) f32. Padded columns (>= d_out_real) are exactly zero
    # (zero weight cols + zero bias => gelu(0) == 0), so the sum/mean is exact;
    # the variance pass masks them only when padding actually exists.
    inv_n = jnp.float32(1.0 / d_out_real)
    mean = jnp.sum(y, axis=-1, keepdims=True) * inv_n
    if d_out_pad == d_out_real:
        centered = y - mean                                   # mask-free fast path
    else:
        lane = lax.broadcasted_iota(jnp.int32, y.shape, dimension=y.ndim - 1)
        centered = jnp.where(lane < d_out_real, y - mean, 0.0)
    var = jnp.sum(centered * centered, axis=-1, keepdims=True) * inv_n
    yn = centered * lax.rsqrt(var + LN_EPS)
    # padded gamma/beta are zero -> padded output columns stay zero
    return yn * g + beta


def _fc_kernel_resident(x_ref, w_ref, p_ref, o_ref, *, d_out_real, d_out_pad,
                        approx_gelu, precision):
    # x_ref: (tm, d_in) tile; w_ref: (d_in, d_out_p) whole-VMEM;
    # p_ref: (3, d_out_p) whole-VMEM = [bias; gamma; beta]
    y = jnp.dot(x_ref[...], w_ref[...],
                preferred_element_type=jnp.float32, precision=precision)
    p = p_ref[...].astype(jnp.float32)
    y = y + p[0:1, :]
    y = _gelu(y, approx_gelu)
    y = _layernorm(y, p[1:2, :], p[2:3, :], d_out_real, d_out_pad)
    o_ref[...] = y.astype(o_ref.dtype)


def _fc_kernel_ktiled(x_ref, w_ref, p_ref, o_ref, *scratch, d_out_real,
                      d_out_pad, approx_gelu, precision):
    # grid = (M_tiles, K_tiles); K is the reduction axis (last, "arbitrary").
    # For f32 outputs the output block (resident across k) is the accumulator.
    acc_ref = scratch[0] if scratch else o_ref
    k = pl.program_id(1)

    @pl.when(k == 0)
    def _():
        acc_ref[...] = jnp.zeros_like(acc_ref)

    acc_ref[...] += jnp.dot(x_ref[...], w_ref[...],
                            preferred_element_type=jnp.float32,
                            precision=precision)

    @pl.when(k == pl.num_programs(1) - 1)
    def _():
        p = p_ref[...].astype(jnp.float32)
        y = acc_ref[...].astype(jnp.float32) + p[0:1, :]
        y = _gelu(y, approx_gelu)
        y = _layernorm(y, p[1:2, :], p[2:3, :], d_out_real, d_out_pad)
        o_ref[...] = y.astype(o_ref.dtype)


@functools.partial(
    jax.jit,
    static_argnames=("tm", "tk", "force_ktiled", "use_bf16",
                     "approximate_gelu", "matmul_precision"))
def fully_connected_layer(x, w, b, gamma, beta, *, tm=512, tk=1024,
                          force_ktiled=False, use_bf16=False,
                          approximate_gelu=False, matmul_precision="default"):
    """x: (..., input_dim); w: (input_dim, output_dim). Returns (..., output_dim)."""
    orig_shape = x.shape
    d_in = orig_shape[-1]
    d_out = w.shape[1]
    out_dtype = x.dtype

    x2 = x.reshape(-1, d_in)
    m = x2.shape[0]

    if use_bf16:
        # Numerics-flagged fast path: halves weight VMEM/HBM bytes and uses the
        # MXU's native bf16 rate. Post-matmul math stays f32.
        x2 = x2.astype(jnp.bfloat16)
        w = w.astype(jnp.bfloat16)

    # --- lane padding of d_out (zero cols + zero bias keep LN stats exact) ---
    d_out_p = _round_up(d_out, _LANE)
    if d_out_p != d_out:
        w = jnp.pad(w, ((0, 0), (0, d_out_p - d_out)))
        b = jnp.pad(b, (0, d_out_p - d_out))
        gamma = jnp.pad(gamma, (0, d_out_p - d_out))
        beta = jnp.pad(beta, (0, d_out_p - d_out))
    # One packed operand instead of three sublane-padded, double-buffered ones.
    params = jnp.stack([b, gamma, beta], axis=0).astype(jnp.float32)

    prec = None if matmul_precision == "default" else lax.Precision.HIGHEST

    # --- generation-aware VMEM budgeting --------------------------------------
    cap = _vmem_capacity_bytes()              # 128 MiB v5e/v6e, 64 MiB v7x
    budget = (3 * cap) // 4                   # ~96 MiB / ~48 MiB
    vmem_limit = min((7 * cap) // 8, 120 * 1024 * 1024)   # headroom for Mosaic

    x_it = x2.dtype.itemsize
    w_it = w.dtype.itemsize
    o_it = jnp.dtype(out_dtype).itemsize

    # --- row tile selection ----------------------------------------------------
    tm_eff = _choose_tm(m, tm)

    def resident_bytes(t):
        return (2 * t * d_in * x_it            # double-buffered x tiles
                + d_in * d_out_p * w_it        # weight, whole-array VMEM (1x)
                + 2 * t * d_out_p * o_it       # double-buffered out tiles
                + 8 * d_out_p * 4)             # packed b/gamma/beta (sublane-padded)

    tm_res = tm_eff
    while resident_bytes(tm_res) > budget and tm_res in _TM_CANDIDATES and tm_res > 64:
        tm_res //= 2
    use_resident = (not force_ktiled) and resident_bytes(tm_res) <= budget

    if use_resident:
        # ---- resident-weight schedule: weight DMA'd once, 1-D grid over M ----
        tm_eff = tm_res
        m_p = _round_up(m, tm_eff)
        if m_p != m:
            x2 = jnp.pad(x2, ((0, m_p - m), (0, 0)))

        kernel = functools.partial(
            _fc_kernel_resident, d_out_real=d_out, d_out_pad=d_out_p,
            approx_gelu=approximate_gelu, precision=prec)
        out = pl.pallas_call(
            kernel,
            out_shape=jax.ShapeDtypeStruct((m_p, d_out_p), out_dtype),
            grid_spec=pltpu.PrefetchScalarGridSpec(
                num_scalar_prefetch=0,
                grid=(m_p // tm_eff,),
                in_specs=[
                    pl.BlockSpec((tm_eff, d_in), lambda i: (i, 0)),      # x tile
                    pl.BlockSpec(memory_space=pltpu.MemorySpace.VMEM),   # weight (1x resident)
                    pl.BlockSpec(memory_space=pltpu.MemorySpace.VMEM),   # bias/gamma/beta pack
                ],
                out_specs=pl.BlockSpec((tm_eff, d_out_p), lambda i: (i, 0)),
            ),
            compiler_params=pltpu.CompilerParams(
                dimension_semantics=("parallel",),
                vmem_limit_bytes=vmem_limit),
        )(x2, w, params)
    else:
        # ---- K-tiled schedule: cap weight residency at (tk, d_out_p) slabs ----
        tm_kt = tm_eff
        tk_eff = min(_round_up(tk, _LANE), _round_up(d_in, _LANE))
        need_acc = jnp.dtype(out_dtype) != jnp.float32

        def ktiled_bytes(t_m, t_k):
            return (2 * t_m * t_k * x_it                      # x tiles (2 bufs)
                    + 2 * t_k * d_out_p * w_it                # weight slabs (2 bufs)
                    + 2 * t_m * d_out_p * o_it                # out tiles
                    + (t_m * d_out_p * 4 if need_acc else 0)  # f32 accumulator
                    + 8 * d_out_p * 4)                        # packed params

        while ktiled_bytes(tm_kt, tk_eff) > budget and tk_eff > _LANE:
            tk_eff = max(_LANE, (tk_eff // 2) // _LANE * _LANE)
        while (ktiled_bytes(tm_kt, tk_eff) > budget
               and tm_kt in _TM_CANDIDATES and tm_kt > 64):
            tm_kt //= 2

        m_p = _round_up(m, tm_kt)
        if m_p != m:
            x2 = jnp.pad(x2, ((0, m_p - m), (0, 0)))
        d_in_p = _round_up(d_in, tk_eff)
        if d_in_p != d_in:
            x2 = jnp.pad(x2, ((0, 0), (0, d_in_p - d_in)))
            w = jnp.pad(w, ((0, d_in_p - d_in), (0, 0)))

        kernel = functools.partial(
            _fc_kernel_ktiled, d_out_real=d_out, d_out_pad=d_out_p,
            approx_gelu=approximate_gelu, precision=prec)
        scratch = [pltpu.VMEM((tm_kt, d_out_p), jnp.float32)] if need_acc else []
        out = pl.pallas_call(
            kernel,
            out_shape=jax.ShapeDtypeStruct((m_p, d_out_p), out_dtype),
            grid_spec=pltpu.PrefetchScalarGridSpec(
                num_scalar_prefetch=0,
                grid=(m_p // tm_kt, d_in_p // tk_eff),
                in_specs=[
                    pl.BlockSpec((tm_kt, tk_eff), lambda i, k: (i, k)),      # x tile
                    pl.BlockSpec((tk_eff, d_out_p), lambda i, k: (k, 0)),    # weight K-slab
                    pl.BlockSpec(memory_space=pltpu.MemorySpace.VMEM),       # bias/gamma/beta pack
                ],
                out_specs=pl.BlockSpec((tm_kt, d_out_p), lambda i, k: (i, 0)),
                scratch_shapes=scratch,
            ),
            compiler_params=pltpu.CompilerParams(
                dimension_semantics=("parallel", "arbitrary"),
                vmem_limit_bytes=vmem_limit),
        )(x2, w, params)

    out = out[:m, :d_out]
    return out.reshape(*orig_shape[:-1], d_out)


def _reference(x, w, b, gamma, beta):
    y = jnp.einsum("...i,io->...o", x, w, precision=lax.Precision.HIGHEST) + b
    y = 0.5 * y * (1.0 + lax.erf(y / math.sqrt(2.0)))
    mu = y.mean(-1, keepdims=True)
    var = ((y - mu) ** 2).mean(-1, keepdims=True)
    return (y - mu) * lax.rsqrt(var + LN_EPS) * gamma + beta


if __name__ == "__main__":
    # Small shapes consistent with the module: (batch, seq, hidden)
    batch, seq, input_dim, output_dim = 2, 8, 32, 32

    key = jax.random.PRNGKey(0)
    kx, kw, kb, kg, kbe, kx2, kw2, kb2 = jax.random.split(key, 8)

    def q(a):
        # Snap values onto the bf16 grid so the MXU's bf16 passes are exact
        # relative to the f32 reference -> precision-agnostic comparisons.
        return a.astype(jnp.bfloat16).astype(jnp.float32)

    x = q(jax.random.normal(kx, (batch, seq, input_dim), jnp.float32))

    # Deterministic parameter init (synthetic; mimics nn.Linear uniform bound).
    bound = 1.0 / math.sqrt(input_dim)
    w = q(jax.random.uniform(kw, (input_dim, output_dim), jnp.float32, -bound, bound))
    b = q(jax.random.uniform(kb, (output_dim,), jnp.float32, -bound, bound))
    gamma = q(1.0 + 0.1 * jax.random.normal(kg, (output_dim,), jnp.float32))
    beta = q(0.1 * jax.random.normal(kbe, (output_dim,), jnp.float32))

    ref = _reference(x, w, b, gamma, beta)

    # 1) default (resident-weight) schedule, d_out padded 32 -> 128 (mask path)
    out = jax.block_until_ready(fully_connected_layer(x, w, b, gamma, beta))
    assert out.shape == (batch, seq, output_dim)
    assert jnp.allclose(out, ref, atol=1e-3, rtol=1e-3), "resident path mismatch"

    # 2) K-tiled accumulator schedule (forced; f32 output accumulates in o_ref)
    out_kt = jax.block_until_ready(
        fully_connected_layer(x, w, b, gamma, beta, force_ktiled=True))
    assert jnp.allclose(out_kt, ref, atol=1e-3, rtol=1e-3), "k-tiled path mismatch"

    # 3) ragged M (exercises adaptive tm, row padding + final slice)
    x3 = q(jax.random.normal(kx2, (3, 5, input_dim), jnp.float32))
    ref3 = _reference(x3, w, b, gamma, beta)
    out3 = jax.block_until_ready(fully_connected_layer(x3, w, b, gamma, beta))
    assert out3.shape == (3, 5, output_dim)
    assert jnp.allclose(out3, ref3, atol=1e-3, rtol=1e-3), "ragged-M mismatch"

    # 4) d_out already a multiple of 128 (mask-free LayerNorm finalize)
    out_dim2 = 128
    w2 = q(jax.random.uniform(kw2, (input_dim, out_dim2), jnp.float32, -bound, bound))
    b2 = q(jax.random.uniform(kb2, (out_dim2,), jnp.float32, -bound, bound))
    g2 = jnp.ones((out_dim2,), jnp.float32)
    be2 = jnp.zeros((out_dim2,), jnp.float32)
    ref2 = _reference(x, w2, b2, g2, be2)
    out2 = jax.block_until_ready(fully_connected_layer(x, w2, b2, g2, be2))
    assert out2.shape == (batch, seq, out_dim2)
    assert jnp.allclose(out2, ref2, atol=1e-3, rtol=1e-3), "lane-dense d_out mismatch"

    print("KERNEL_OK")
</pallas_src>

<mosaic_0001>
module attributes {stable_mosaic.version = 11 : i64} {
  func.func @_fc_kernel_resident(%arg0: i32, %arg1: memref<8x32xf32, #tpu.memory_space<vmem>>, %arg2: memref<32x128xf32, #tpu.memory_space<vmem>>, %arg3: memref<3x128xf32, #tpu.memory_space<vmem>>, %arg4: memref<8x128xf32, #tpu.memory_space<vmem>>) attributes {dimension_semantics = [#tpu.dimension_semantics<parallel>], iteration_bounds = array<i64: 2>, scalar_prefetch = 0 : i64, scratch_operands = 0 : i64, tpu.core_type = #tpu.core_type<tc>, window_params = [{transform_indices = @transform_0, window_bounds = array<i64: 8, 32>}, {pipeline_mode = #tpu.pipeline_mode<synchronous>, transform_indices = @transform_1, window_bounds = array<i64: 32, 128>}, {pipeline_mode = #tpu.pipeline_mode<synchronous>, transform_indices = @transform_2, window_bounds = array<i64: 3, 128>}, {transform_indices = @transform_3, window_bounds = array<i64: 8, 128>}]} {
    %c0 = arith.constant 0 : index
    %c0_0 = arith.constant 0 : index
    %0 = vector.load %arg1[%c0, %c0_0] : memref<8x32xf32, #tpu.memory_space<vmem>>, vector<8x32xf32>
    %c0_1 = arith.constant 0 : index
    %c0_2 = arith.constant 0 : index
    %1 = vector.load %arg2[%c0_1, %c0_2] : memref<32x128xf32, #tpu.memory_space<vmem>>, vector<32x128xf32>
    %cst = arith.constant dense<0.000000e+00> : vector<8x128xf32>
    %2 = tpu.matmul %0, %1, %cst {dimension_numbers = #tpu.dot_dimension_numbers<[1], [0], [0], [1], [0, 0, 1, 1], [], []>} : vector<8x32xf32>, vector<32x128xf32>, vector<8x128xf32> -> vector<8x128xf32>
    %c0_3 = arith.constant 0 : index
    %c0_4 = arith.constant 0 : index
    %3 = vector.load %arg3[%c0_3, %c0_4] : memref<3x128xf32, #tpu.memory_space<vmem>>, vector<3x128xf32>
    %4 = vector.extract_strided_slice %3 {offsets = [0, 0], sizes = [1, 128], strides = [1, 1]} : vector<3x128xf32> to vector<1x128xf32>
    %5 = vector.broadcast %4 : vector<1x128xf32> to vector<8x128xf32>
    %6 = arith.addf %2, %5 : vector<8x128xf32>
    %cst_5 = arith.constant 5.000000e-01 : f32
    %7 = vector.broadcast %cst_5 : f32 to vector<8x128xf32>
    %8 = arith.mulf %7, %6 : vector<8x128xf32>
    %cst_6 = arith.constant 0.707106769 : f32
    %9 = vector.broadcast %cst_6 : f32 to vector<8x128xf32>
    %10 = arith.mulf %6, %9 : vector<8x128xf32>
    %11 = math.erf %10 : vector<8x128xf32>
    %cst_7 = arith.constant 1.000000e+00 : f32
    %12 = vector.broadcast %cst_7 : f32 to vector<8x128xf32>
    %13 = arith.addf %12, %11 : vector<8x128xf32>
    %14 = arith.mulf %8, %13 : vector<8x128xf32>
    %15 = vector.extract_strided_slice %3 {offsets = [1, 0], sizes = [1, 128], strides = [1, 1]} : vector<3x128xf32> to vector<1x128xf32>
    %16 = vector.extract_strided_slice %3 {offsets = [2, 0], sizes = [1, 128], strides = [1, 1]} : vector<3x128xf32> to vector<1x128xf32>
    %cst_8 = arith.constant dense<0.000000e+00> : vector<8xf32>
    %17 = vector.multi_reduction <add>, %14, %cst_8 [1] : vector<8x128xf32> to vector<8xf32>
    %18 = vector.shape_cast %17 : vector<8xf32> to vector<8x1xf32>
    %cst_9 = arith.constant 3.125000e-02 : f32
    %19 = vector.broadcast %cst_9 : f32 to vector<8x1xf32>
    %20 = arith.mulf %18, %19 : vector<8x1xf32>
    %21 = tpu.iota {dimensions = array<i32: 1>} : vector<8x128xi32>
    %c32_i32 = arith.constant 32 : i32
    %22 = vector.broadcast %c32_i32 : i32 to vector<8x128xi32>
    %23 = arith.cmpi slt, %21, %22 : vector<8x128xi32>
    %24 = vector.broadcast %20 : vector<8x1xf32> to vector<8x128xf32>
    %25 = arith.subf %14, %24 : vector<8x128xf32>
    %cst_10 = arith.constant 0.000000e+00 : f32
    %26 = vector.broadcast %cst_10 : f32 to vector<8x128xf32>
    %27 = arith.select %23, %25, %26 : vector<8x128xi1>, vector<8x128xf32>
    %28 = arith.mulf %27, %27 : vector<8x128xf32>
    %cst_11 = arith.constant dense<0.000000e+00> : vector<8xf32>
    %29 = vector.multi_reduction <add>, %28, %cst_11 [1] : vector<8x128xf32> to vector<8xf32>
    %30 = vector.shape_cast %29 : vector<8xf32> to vector<8x1xf32>
    %cst_12 = arith.constant 3.125000e-02 : f32
    %31 = vector.broadcast %cst_12 : f32 to vector<8x1xf32>
    %32 = arith.mulf %30, %31 : vector<8x1xf32>
    %cst_13 = arith.constant 9.99999974E-6 : f32
    %33 = vector.broadcast %cst_13 : f32 to vector<8x1xf32>
    %34 = arith.addf %32, %33 : vector<8x1xf32>
    %35 = math.rsqrt %34 : vector<8x1xf32>
    %36 = vector.broadcast %35 : vector<8x1xf32> to vector<8x128xf32>
    %37 = arith.mulf %27, %36 : vector<8x128xf32>
    %38 = vector.broadcast %15 : vector<1x128xf32> to vector<8x128xf32>
    %39 = arith.mulf %37, %38 : vector<8x128xf32>
    %40 = vector.broadcast %16 : vector<1x128xf32> to vector<8x128xf32>
    %41 = arith.addf %39, %40 : vector<8x128xf32>
    %c0_14 = arith.constant 0 : index
    %c0_15 = arith.constant 0 : index
    %42 = vector.load %arg4[%c0_14, %c0_15] : memref<8x128xf32, #tpu.memory_space<vmem>>, vector<8x128xf32>
    tpu.vector_store %arg4[%c0_14, %c0_15], %41 {strides = array<i32>} : memref<8x128xf32, #tpu.memory_space<vmem>>, vector<8x128xf32>,
    return
  }
  func.func @transform_0(%arg0: i32) -> (i32, i32) {
    %c0_i32 = arith.constant 0 : i32
    %c0_i32_0 = arith.constant 0 : i32
    return %arg0, %c0_i32 : i32, i32
  }
  func.func @transform_1(%arg0: i32) -> (i32, i32) {
    %c0_i32 = arith.constant 0 : i32
    %c0_i32_0 = arith.constant 0 : i32
    %c0_i32_1 = arith.constant 0 : i32
    return %c0_i32, %c0_i32_0 : i32, i32
  }
  func.func @transform_2(%arg0: i32) -> (i32, i32) {
    %c0_i32 = arith.constant 0 : i32
    %c0_i32_0 = arith.constant 0 : i32
    %c0_i32_1 = arith.constant 0 : i32
    return %c0_i32, %c0_i32_0 : i32, i32
  }
  func.func @transform_3(%arg0: i32) -> (i32, i32) {
    %c0_i32 = arith.constant 0 : i32
    %c0_i32_0 = arith.constant 0 : i32
    return %arg0, %c0_i32 : i32, i32
  }
}

</mosaic_0001>

<bundles_post_ra>
// kernel: fully_connected_layer.1
= control target key start
LH: loop header
LB: loop body
LE: loop exit
PB: predicated region body
PF: predicated region fallthrough
CT: control target
= control target key end

     0   :  { %s412_s12 = smov 0   ;;  %s451_s0 = inlined_call_operand.vmem [shape: f32[16,32], index: 0, kind: input, shape index: {}]   ;;  %s452_s1 = inlined_call_operand.vmem [shape: f32[32,128], index: 1, kind: input, shape index: {}]   ;;  %s453_s2 = inlined_call_operand.vmem [shape: f32[3,128], index: 2, kind: input, shape index: {}]   ;;  %s454_s3 = inlined_call_operand.vmem [shape: f32[16,128], index: 3, kind: output, shape index: {}]  }
   0x1 LB: > { %s334_s13 = sadd.s32 4294967295, %s387_s12   ;;  %p338_p0 = scmp.ge.s32.totalorder %s387_s12, 1  ;;  %s387_s12 = sphi %s412_s12, %s13_s12  }
   0x2   : > { %p136_p1 = scmp.lt.s32.totalorder %s387_s12, 3 }
   0x4   : > { %p137_p2 = pnand %p338_p0, %p136_p1 }
   0x5   : > { %v167_v0 = vld [vmem:[%s452_s1] sm:$0xff] (!%p137_p2)  ;;  %v168_v1 = vld [vmem:[%s452_s1 + $0x8] sm:$0xff] (!%p137_p2)  ;;  %v169_v2 = vld [vmem:[%s452_s1 + $0x10] sm:$0xff] (!%p137_p2)  ;;  %v389_v3 = vmov (!%p137_p2), 0.0|0.0   ;;  %vm390_vm0 = vmmov (!%p137_p2), 0   ;;  %v391_v6 = vmov (!%p137_p2), 0.0   ;;  %v172_v9 = vlaneseq (!%p137_p2) }
   0x6   : > { %140 = sbr.rel (%p137_p2) target bundleno = 561 (0x231), region = 32  ;;  %360 = vmatprep.subr.bf16.mxu0 (!%p137_p2), %v389_v3  ;;  %v361_v4 = vpack.c.bf16 (!%p137_p2), %v168_v1, %v167_v0  ;;  %v170_v5 = vld [vmem:[%s452_s1 + $0x18] sm:$0xff] (!%p137_p2)  ;;  %357 = vmatprep.mubr.msk.f32.mxu0 (!%p137_p2), %vm390_vm0, %v391_v6  ;;  %p158_p3 = scmp.lt.s32.totalorder (!%p137_p2), %s334_s13, 1  ;;  %vm176_vm1 = vcmask (!%p137_p2), 261120   ;;  %v171_v12 = vld [vmem:[%s453_s2] sm:$0x7] (!%p137_p2) }
   0x7   : > { %v364_v7 = vpack.c.bf16 (!%p137_p2), %v170_v5, %v169_v2  ;;  %v173_v10 = vshrl.u32 (!%p137_p2), %v172_v9, 7  ;;  %v259_v22 = vand.u32 (!%p137_p2), 127, %v172_v9 }
   0x8   : > { %362 = vmatpush3.bf16.msra.mxu0 (!%p137_p2), %v361_v4 }
   0x9   : > { %363 = vmatprep.subr.bf16.mxu0 (!%p137_p2), %v389_v3  ;;  %v174_v11 = vsub.s32 (!%p137_p2), 0, %v173_v10  ;;  %vm260_vm2 = vcmp.lt.s32.totalorder (!%p137_p2), %v259_v22, 32  ;;  %v272_v31 = vsub.s32 (!%p137_p2), 1, %v173_v10  ;;  %v277_v32 = vsub.s32 (!%p137_p2), 2, %v173_v10 }
   0xb   : > { %v175_v13 = vrot.slane (!%p137_p2), %v171_v12, %v174_v11  ;;  %v273_v33 = vrot.slane (!%p137_p2), %v171_v12, %v272_v31  ;;  %v278_v35 = vrot.slane (!%p137_p2), %v171_v12, %v277_v32 }
   0xc   : > { %365 = vmatpush3.bf16.msra.mxu0 (!%p137_p2), %v364_v7 }
   0xd   : > { %s456_s13 = smov (!%p158_p3, %s334_s13), 1 }
   0xe   : > { %s339_s22 = sshll.u32 %s456_s13, 3 }
   0xf   : > { %s161_s25 = scalar_lea.vmem %s451_s0, %s339_s22  ;;  %s165_s30 = scalar_lea.vmem %s454_s3, %s339_s22 }
  0x10   : > { %v166_v8 = vld [vmem:[%s161_s25] sm:$0xff] }
  0x11   : > { %358 = vmatmul.mubr.msk.f32.vlgmr.msra.gmra.mrb[0].mxu0 %vm176_vm1, %v166_v8 }
  0xe4   : > { %v246_v14 = vpop.f32.mrb[0].mxu0 }
  0xe5   : > { %v247_v15 = vadd.f32 %v246_v14, %v175_v13  ;;  %v359_v16 = vpop.f32.mrb[1].mxu0 }
  0xe7   : > { %v251_v17 = vmul.f32 0.70710677, %v247_v15  ;;  %v250_v19 = vmul.f32 0.5, %v247_v15 }
  0xe9   : > { %377 = verf.f32 %v251_v17 }
  0xf3   : > { %v378_v18 = vpop.eup %377 }
  0xf4   : > { %v253_v20 = vadd.f32 1.0, %v378_v18 }
  0xf6   : > { %v254_v21 = vmul.f32 %v253_v20, %v250_v19 }
  0xf8   : > { %255 = vadd.xlane.f32.xlu0 %v254_v21 }
 0x185   : > { %v256_v23 = vpop.xlane.xlu0 %255 }
 0x186   : > { %v257_v24 = vmul.f32 0.03125, %v256_v23 }
 0x188   : > { %v261_v25 = vsub.f32 %v254_v21, %v257_v24 }
 0x18a   : > { %v262_v26 = vsel %vm260_vm2, %v261_v25, 0.0 }
 0x18b   : > { %v263_v27 = vmul.f32 %v262_v26, %v262_v26 }
 0x18d   : > { %264 = vadd.xlane.f32.xlu0 %v263_v27 }
 0x21a   : > { %v265_v28 = vpop.xlane.xlu0 %264 }
 0x21b   : > { %v266_v29 = vmul.f32 0.03125, %v265_v28 }
 0x21d   : > { %v267_v30 = vadd.f32 1e-05, %v266_v29 }
 0x21f   : > { %379 = vrsqrt.f32 %v267_v30 }
 0x229   : > { %v380_v34 = vpop.eup %379 }
 0x22a   : > { %v269_v36 = vmul.f32 %v380_v34, %v262_v26 }
 0x22c   : > { %v274_v37 = vmul.f32 %v273_v33, %v269_v36 }
 0x22e   : > { %v279_v38 = vadd.f32 %v278_v35, %v274_v37 }
 0x230   : > { %280 = vst [vmem:[%s165_s30] sm:$0xff] %v279_v38 }
 0x231 PF: > { %s13_s12 = sadd.s32 1, %s387_s12  }
 0x232   : > { %p10_p4 = scmp.ge.s32.totalorder %s13_s12, 4  }
 0x234   :  { %12 = sbr.rel (!%p10_p4) target bundleno = 1 (0x1), region = 62 }

</bundles_post_ra>
